<compile_context>
chip_gen: v6e
topology: v6e:2x2x1
jax: 0.10.0
libtpu: 0.0.40
codegen_flags: <defaults>
</compile_context>

<pallas_src>
import functools

import jax
import jax.numpy as jnp
from jax import lax
from jax.experimental import pallas as pl
from jax.experimental.pallas import tpu as pltpu

Config = {"hidden_size": 32}


# ----------------------------------------------------------------------------
# Pallas kernel: input projection + GRU recurrence + FC head, one invocation.
# All operands live fully in VMEM (total footprint < 64 KiB).
# Row convention everywhere inside the kernel: time-major, row = t*B + b.
# ----------------------------------------------------------------------------
def _gru_fused_kernel(
    x_ref,      # (T*B, I)  time-major input rows
    h0_ref,     # (B, H)    initial hidden state
    wi_ref,     # (I, 3H)   fused input weights, columns ordered [r | z | n]
    bi_ref,     # (1, 3H)   fused bias: b_ih + [b_hr | b_hz | 0]
    wh_ref,     # (H, 3H)   fused recurrent weights, columns ordered [r | z | n]
    bhn_ref,    # (1, H)    recurrent n-gate bias b_hn
    wfc_ref,    # (H, O)    fc weight (pre-transposed)
    bfc_ref,    # (1, O)    fc bias
    out_ref,    # (T*B, O)  fc(h_t) for all (t, b), time-major rows
    hout_ref,   # (B, H)    final hidden state (aliased with h0's buffer)
    h_all_scr,  # VMEM scratch (T*B, H): per-step hidden states for the FC head
):
    B, H = h0_ref.shape
    TB = x_ref.shape[0]
    T = TB // B
    H2 = 2 * H
    H3 = 3 * H

    # ---- Phase 1: hoisted input projection for ALL timesteps (one MXU push).
    # Recurrent r/z biases are pre-folded into bi, so the per-step recurrent
    # dot below needs no bias add at all.
    xp = (
        jnp.dot(x_ref[...], wi_ref[...], preferred_element_type=jnp.float32)
        + bi_ref[...]
    )                                   # (T*B, 3H), time-major rows

    wh = wh_ref[...]                    # (H, 3H)  hoisted, loop-invariant
    bhn = bhn_ref[...]                  # (1, H)   hoisted, loop-invariant
    h = h0_ref[...]                     # (B, H)   carried in vregs

    # ---- Phase 2: sequential recurrence. T is a static Python int, so the
    # loop is fully unrolled at trace time (LLO sees the whole chain); all
    # slices are static & contiguous (no per-step gathers / relayouts).
    # For long sequences switch this to lax.fori_loop with modest unroll.
    for t in range(T):
        xp_t = xp[t * B:(t + 1) * B, :]                       # (B, 3H) contiguous
        gh = jnp.dot(h, wh, preferred_element_type=jnp.float32)   # (B, 3H), 1 MXU push

        # PyTorch GRU (gate order r, z, n), with b_hr/b_hz folded into xp_t:
        #   r = sigmoid(xp_r + h W_hr^T)
        #   z = sigmoid(xp_z + h W_hz^T)
        #   n = tanh   (xp_n + r * (h W_hn^T + b_hn))
        #   h' = (1 - z) * n + z * h
        rz = jax.nn.sigmoid(xp_t[:, 0:H2] + gh[:, 0:H2])      # one EUP push for r & z
        r = rz[:, 0:H]
        z = rz[:, H:H2]
        n = jnp.tanh(xp_t[:, H2:H3] + r * (gh[:, H2:H3] + bhn))
        h = (1.0 - z) * n + z * h

        h_all_scr[t * B:(t + 1) * B, :] = h                   # contiguous sublane store

    # ---- Phase 3: fused Linear head over all timesteps (one MXU push, one store).
    out_ref[...] = (
        jnp.dot(h_all_scr[...], wfc_ref[...], preferred_element_type=jnp.float32)
        + bfc_ref[...]
    )
    hout_ref[...] = h


# ----------------------------------------------------------------------------
# Wrapper: parameter fusing / bias folding / layout plumbing in plain JAX.
# ----------------------------------------------------------------------------
def language_detector_forward(x, h, params):
    """x: (B, T, I) float32, h: (1, B, H) float32. Returns (out (B,T,O), h (1,B,H))."""
    B, T, I = x.shape
    H = params["weight_hh"].shape[1]
    O = params["fc_w"].shape[0]

    # PyTorch layout: weight_ih (3H, I), weight_hh (3H, H), gate order r,z,n.
    # Transposing gives fused operands whose COLUMN blocks are [r | z | n].
    wi = params["weight_ih"].T.astype(jnp.float32)        # (I, 3H)
    wh = params["weight_hh"].T.astype(jnp.float32)        # (H, 3H)
    b_ih = params["bias_ih"].astype(jnp.float32)          # (3H,)
    b_hh = params["bias_hh"].astype(jnp.float32)          # (3H,)
    # Fold loop-invariant recurrent r/z biases into the Phase-1 bias; only the
    # n-gate keeps a separate (1, H) recurrent bias (it sits inside r * (...)).
    bi = (b_ih + jnp.concatenate([b_hh[: 2 * H],
                                  jnp.zeros((H,), jnp.float32)]))[None]   # (1, 3H)
    bhn = b_hh[2 * H:][None]                               # (1, H)
    wfc = params["fc_w"].T.astype(jnp.float32)             # (H, O)
    bfc = params["fc_b"][None].astype(jnp.float32)         # (1, O)

    # Time-major rows (row = t*B + b): per-step kernel slices are contiguous.
    x_tm = jnp.transpose(x.astype(jnp.float32), (1, 0, 2)).reshape(T * B, I)
    h0 = h[0].astype(jnp.float32)                          # (B, H)

    vmem = pltpu.MemorySpace.VMEM
    out2d, h_final = pl.pallas_call(
        _gru_fused_kernel,
        out_shape=(
            jax.ShapeDtypeStruct((T * B, O), jnp.float32),
            jax.ShapeDtypeStruct((B, H), jnp.float32),
        ),
        in_specs=[pl.BlockSpec(memory_space=vmem)] * 8,
        out_specs=(
            pl.BlockSpec(memory_space=vmem),
            pl.BlockSpec(memory_space=vmem),
        ),
        scratch_shapes=[pltpu.VMEM((T * B, H), jnp.float32)],
        # Carried hidden state: reuse h0's buffer for the final hidden state so
        # streaming callers chain chunks without an extra allocation/copy.
        input_output_aliases={1: 1},
    )(x_tm, h0, wi, bi, wh, bhn, wfc, bfc)

    out = jnp.transpose(out2d.reshape(T, B, O), (1, 0, 2))  # back to batch-first
    return out, h_final[None]                               # (1, B, H) like PyTorch


# ----------------------------------------------------------------------------
# Pure-JAX reference (for correctness check).
# ----------------------------------------------------------------------------
def reference_forward(x, h, params):
    H = params["weight_hh"].shape[1]
    w_ih, w_hh = params["weight_ih"], params["weight_hh"]
    b_ih, b_hh = params["bias_ih"], params["bias_hh"]
    wir, wiz, win = w_ih[0:H].T, w_ih[H:2 * H].T, w_ih[2 * H:3 * H].T
    whr, whz, whn = w_hh[0:H].T, w_hh[H:2 * H].T, w_hh[2 * H:3 * H].T
    bir, biz, bin_ = b_ih[0:H], b_ih[H:2 * H], b_ih[2 * H:3 * H]
    bhr, bhz, bhn = b_hh[0:H], b_hh[H:2 * H], b_hh[2 * H:3 * H]

    def step(hprev, x_t):
        r = jax.nn.sigmoid(x_t @ wir + bir + hprev @ whr + bhr)
        z = jax.nn.sigmoid(x_t @ wiz + biz + hprev @ whz + bhz)
        n = jnp.tanh(x_t @ win + bin_ + r * (hprev @ whn + bhn))
        hn = (1.0 - z) * n + z * hprev
        return hn, hn

    x_tm = jnp.transpose(x, (1, 0, 2))
    h_final, hs = lax.scan(step, h[0], x_tm)
    out = hs @ params["fc_w"].T + params["fc_b"]
    return jnp.transpose(out, (1, 0, 2)), h_final[None]


# ----------------------------------------------------------------------------
# Main
# ----------------------------------------------------------------------------
if __name__ == "__main__":
    input_size = 64
    hidden_size = Config["hidden_size"]   # 32
    output_size = 3
    batch = 2
    seq = 8

    key = jax.random.PRNGKey(0)
    ks = jax.random.split(key, 8)
    scale = 1.0 / jnp.sqrt(hidden_size)

    params = {
        "weight_ih": jax.random.uniform(ks[0], (3 * hidden_size, input_size),
                                        jnp.float32, -scale, scale),
        "weight_hh": jax.random.uniform(ks[1], (3 * hidden_size, hidden_size),
                                        jnp.float32, -scale, scale),
        "bias_ih": jax.random.uniform(ks[2], (3 * hidden_size,), jnp.float32, -scale, scale),
        "bias_hh": jax.random.uniform(ks[3], (3 * hidden_size,), jnp.float32, -scale, scale),
        "fc_w": jax.random.uniform(ks[4], (output_size, hidden_size),
                                   jnp.float32, -scale, scale),
        "fc_b": jax.random.uniform(ks[5], (output_size,), jnp.float32, -scale, scale),
    }

    x = jax.random.normal(ks[6], (batch, seq, input_size), jnp.float32)
    h0 = jnp.zeros((1, batch, hidden_size), jnp.float32)   # init_hidden

    fwd = jax.jit(functools.partial(language_detector_forward, params=params))
    out, h_n = fwd(x, h0)
    jax.block_until_ready((out, h_n))

    out_ref, h_ref = reference_forward(x, h0, params)
    assert out.shape == (batch, seq, output_size)
    assert h_n.shape == (1, batch, hidden_size)
    assert jnp.allclose(out, out_ref, atol=3e-5, rtol=3e-5)
    assert jnp.allclose(h_n, h_ref, atol=3e-5, rtol=3e-5)

    print("KERNEL_OK")
</pallas_src>

<mosaic_0001>
module attributes {stable_mosaic.version = 11 : i64} {
  func.func @_gru_fused_kernel(%arg0: memref<16x64xf32, #tpu.memory_space<vmem>>, %arg1: memref<2x32xf32, #tpu.memory_space<vmem>>, %arg2: memref<64x96xf32, #tpu.memory_space<vmem>>, %arg3: memref<1x96xf32, #tpu.memory_space<vmem>>, %arg4: memref<32x96xf32, #tpu.memory_space<vmem>>, %arg5: memref<1x32xf32, #tpu.memory_space<vmem>>, %arg6: memref<32x3xf32, #tpu.memory_space<vmem>>, %arg7: memref<1x3xf32, #tpu.memory_space<vmem>>, %arg8: memref<16x3xf32, #tpu.memory_space<vmem>>, %arg9: memref<2x32xf32, #tpu.memory_space<vmem>>, %arg10: memref<16x32xf32, #tpu.memory_space<vmem>>) attributes {dimension_semantics = [], scalar_prefetch = 0 : i64, scratch_operands = 1 : i64, tpu.core_type = #tpu.core_type<tc>} {
    %c0 = arith.constant 0 : index
    %c0_0 = arith.constant 0 : index
    %0 = vector.load %arg0[%c0, %c0_0] : memref<16x64xf32, #tpu.memory_space<vmem>>, vector<16x64xf32>
    %c0_1 = arith.constant 0 : index
    %c0_2 = arith.constant 0 : index
    %1 = vector.load %arg2[%c0_1, %c0_2] : memref<64x96xf32, #tpu.memory_space<vmem>>, vector<64x96xf32>
    %cst = arith.constant dense<0.000000e+00> : vector<16x96xf32>
    %2 = tpu.matmul %0, %1, %cst {dimension_numbers = #tpu.dot_dimension_numbers<[1], [0], [0], [1], [0, 0, 1, 1], [], []>} : vector<16x64xf32>, vector<64x96xf32>, vector<16x96xf32> -> vector<16x96xf32>
    %c0_3 = arith.constant 0 : index
    %c0_4 = arith.constant 0 : index
    %3 = vector.load %arg3[%c0_3, %c0_4] : memref<1x96xf32, #tpu.memory_space<vmem>>, vector<1x96xf32>
    %4 = vector.broadcast %3 : vector<1x96xf32> to vector<16x96xf32>
    %5 = arith.addf %2, %4 : vector<16x96xf32>
    %c0_5 = arith.constant 0 : index
    %c0_6 = arith.constant 0 : index
    %6 = vector.load %arg4[%c0_5, %c0_6] : memref<32x96xf32, #tpu.memory_space<vmem>>, vector<32x96xf32>
    %c0_7 = arith.constant 0 : index
    %c0_8 = arith.constant 0 : index
    %7 = vector.load %arg5[%c0_7, %c0_8] : memref<1x32xf32, #tpu.memory_space<vmem>>, vector<1x32xf32>
    %c0_9 = arith.constant 0 : index
    %c0_10 = arith.constant 0 : index
    %8 = vector.load %arg1[%c0_9, %c0_10] : memref<2x32xf32, #tpu.memory_space<vmem>>, vector<2x32xf32>
    %9 = vector.extract_strided_slice %5 {offsets = [0, 0], sizes = [2, 96], strides = [1, 1]} : vector<16x96xf32> to vector<2x96xf32>
    %cst_11 = arith.constant dense<0.000000e+00> : vector<2x96xf32>
    %10 = tpu.matmul %8, %6, %cst_11 {dimension_numbers = #tpu.dot_dimension_numbers<[1], [0], [0], [1], [0, 0, 1, 1], [], []>} : vector<2x32xf32>, vector<32x96xf32>, vector<2x96xf32> -> vector<2x96xf32>
    %11 = vector.extract_strided_slice %9 {offsets = [0, 0], sizes = [2, 64], strides = [1, 1]} : vector<2x96xf32> to vector<2x64xf32>
    %12 = vector.extract_strided_slice %10 {offsets = [0, 0], sizes = [2, 64], strides = [1, 1]} : vector<2x96xf32> to vector<2x64xf32>
    %13 = arith.addf %11, %12 : vector<2x64xf32>
    %14 = arith.negf %13 : vector<2x64xf32>
    %15 = math.exp %14 : vector<2x64xf32>
    %cst_12 = arith.constant 1.000000e+00 : f32
    %16 = vector.broadcast %cst_12 : f32 to vector<2x64xf32>
    %17 = arith.addf %16, %15 : vector<2x64xf32>
    %18 = arith.divf %16, %17 : vector<2x64xf32>
    %19 = vector.extract_strided_slice %18 {offsets = [0, 0], sizes = [2, 32], strides = [1, 1]} : vector<2x64xf32> to vector<2x32xf32>
    %20 = vector.extract_strided_slice %18 {offsets = [0, 32], sizes = [2, 32], strides = [1, 1]} : vector<2x64xf32> to vector<2x32xf32>
    %21 = vector.extract_strided_slice %9 {offsets = [0, 64], sizes = [2, 32], strides = [1, 1]} : vector<2x96xf32> to vector<2x32xf32>
    %22 = vector.extract_strided_slice %10 {offsets = [0, 64], sizes = [2, 32], strides = [1, 1]} : vector<2x96xf32> to vector<2x32xf32>
    %23 = vector.broadcast %7 : vector<1x32xf32> to vector<2x32xf32>
    %24 = arith.addf %22, %23 : vector<2x32xf32>
    %25 = arith.mulf %19, %24 : vector<2x32xf32>
    %26 = arith.addf %21, %25 : vector<2x32xf32>
    %27 = math.tanh %26 : vector<2x32xf32>
    %cst_13 = arith.constant 1.000000e+00 : f32
    %28 = vector.broadcast %cst_13 : f32 to vector<2x32xf32>
    %29 = arith.subf %28, %20 : vector<2x32xf32>
    %30 = arith.mulf %29, %27 : vector<2x32xf32>
    %31 = arith.mulf %20, %8 : vector<2x32xf32>
    %32 = arith.addf %30, %31 : vector<2x32xf32>
    %c0_14 = arith.constant 0 : index
    %c0_15 = arith.constant 0 : index
    %33 = vector.load %arg10[%c0_14, %c0_15] : memref<16x32xf32, #tpu.memory_space<vmem>>, vector<2x32xf32>
    tpu.vector_store %arg10[%c0_14, %c0_15], %32 {strides = array<i32>} : memref<16x32xf32, #tpu.memory_space<vmem>>, vector<2x32xf32>,
    %34 = vector.extract_strided_slice %5 {offsets = [2, 0], sizes = [2, 96], strides = [1, 1]} : vector<16x96xf32> to vector<2x96xf32>
    %cst_16 = arith.constant dense<0.000000e+00> : vector<2x96xf32>
    %35 = tpu.matmul %32, %6, %cst_16 {dimension_numbers = #tpu.dot_dimension_numbers<[1], [0], [0], [1], [0, 0, 1, 1], [], []>} : vector<2x32xf32>, vector<32x96xf32>, vector<2x96xf32> -> vector<2x96xf32>
    %36 = vector.extract_strided_slice %34 {offsets = [0, 0], sizes = [2, 64], strides = [1, 1]} : vector<2x96xf32> to vector<2x64xf32>
    %37 = vector.extract_strided_slice %35 {offsets = [0, 0], sizes = [2, 64], strides = [1, 1]} : vector<2x96xf32> to vector<2x64xf32>
    %38 = arith.addf %36, %37 : vector<2x64xf32>
    %39 = arith.negf %38 : vector<2x64xf32>
    %40 = math.exp %39 : vector<2x64xf32>
    %cst_17 = arith.constant 1.000000e+00 : f32
    %41 = vector.broadcast %cst_17 : f32 to vector<2x64xf32>
    %42 = arith.addf %41, %40 : vector<2x64xf32>
    %43 = arith.divf %41, %42 : vector<2x64xf32>
    %44 = vector.extract_strided_slice %43 {offsets = [0, 0], sizes = [2, 32], strides = [1, 1]} : vector<2x64xf32> to vector<2x32xf32>
    %45 = vector.extract_strided_slice %43 {offsets = [0, 32], sizes = [2, 32], strides = [1, 1]} : vector<2x64xf32> to vector<2x32xf32>
    %46 = vector.extract_strided_slice %34 {offsets = [0, 64], sizes = [2, 32], strides = [1, 1]} : vector<2x96xf32> to vector<2x32xf32>
    %47 = vector.extract_strided_slice %35 {offsets = [0, 64], sizes = [2, 32], strides = [1, 1]} : vector<2x96xf32> to vector<2x32xf32>
    %48 = vector.broadcast %7 : vector<1x32xf32> to vector<2x32xf32>
    %49 = arith.addf %47, %48 : vector<2x32xf32>
    %50 = arith.mulf %44, %49 : vector<2x32xf32>
    %51 = arith.addf %46, %50 : vector<2x32xf32>
    %52 = math.tanh %51 : vector<2x32xf32>
    %cst_18 = arith.constant 1.000000e+00 : f32
    %53 = vector.broadcast %cst_18 : f32 to vector<2x32xf32>
    %54 = arith.subf %53, %45 : vector<2x32xf32>
    %55 = arith.mulf %54, %52 : vector<2x32xf32>
    %56 = arith.mulf %45, %32 : vector<2x32xf32>
    %57 = arith.addf %55, %56 : vector<2x32xf32>
    %c2 = arith.constant 2 : index
    %c0_19 = arith.constant 0 : index
    %58 = vector.load %arg10[%c2, %c0_19] : memref<16x32xf32, #tpu.memory_space<vmem>>, vector<2x32xf32>
    tpu.vector_store %arg10[%c2, %c0_19], %57 {strides = array<i32>} : memref<16x32xf32, #tpu.memory_space<vmem>>, vector<2x32xf32>,
    %59 = vector.extract_strided_slice %5 {offsets = [4, 0], sizes = [2, 96], strides = [1, 1]} : vector<16x96xf32> to vector<2x96xf32>
    %cst_20 = arith.constant dense<0.000000e+00> : vector<2x96xf32>
    %60 = tpu.matmul %57, %6, %cst_20 {dimension_numbers = #tpu.dot_dimension_numbers<[1], [0], [0], [1], [0, 0, 1, 1], [], []>} : vector<2x32xf32>, vector<32x96xf32>, vector<2x96xf32> -> vector<2x96xf32>
    %61 = vector.extract_strided_slice %59 {offsets = [0, 0], sizes = [2, 64], strides = [1, 1]} : vector<2x96xf32> to vector<2x64xf32>
    %62 = vector.extract_strided_slice %60 {offsets = [0, 0], sizes = [2, 64], strides = [1, 1]} : vector<2x96xf32> to vector<2x64xf32>
    %63 = arith.addf %61, %62 : vector<2x64xf32>
    %64 = arith.negf %63 : vector<2x64xf32>
    %65 = math.exp %64 : vector<2x64xf32>
    %cst_21 = arith.constant 1.000000e+00 : f32
    %66 = vector.broadcast %cst_21 : f32 to vector<2x64xf32>
    %67 = arith.addf %66, %65 : vector<2x64xf32>
    %68 = arith.divf %66, %67 : vector<2x64xf32>
    %69 = vector.extract_strided_slice %68 {offsets = [0, 0], sizes = [2, 32], strides = [1, 1]} : vector<2x64xf32> to vector<2x32xf32>
    %70 = vector.extract_strided_slice %68 {offsets = [0, 32], sizes = [2, 32], strides = [1, 1]} : vector<2x64xf32> to vector<2x32xf32>
    %71 = vector.extract_strided_slice %59 {offsets = [0, 64], sizes = [2, 32], strides = [1, 1]} : vector<2x96xf32> to vector<2x32xf32>
    %72 = vector.extract_strided_slice %60 {offsets = [0, 64], sizes = [2, 32], strides = [1, 1]} : vector<2x96xf32> to vector<2x32xf32>
    %73 = vector.broadcast %7 : vector<1x32xf32> to vector<2x32xf32>
    %74 = arith.addf %72, %73 : vector<2x32xf32>
    %75 = arith.mulf %69, %74 : vector<2x32xf32>
    %76 = arith.addf %71, %75 : vector<2x32xf32>
    %77 = math.tanh %76 : vector<2x32xf32>
    %cst_22 = arith.constant 1.000000e+00 : f32
    %78 = vector.broadcast %cst_22 : f32 to vector<2x32xf32>
    %79 = arith.subf %78, %70 : vector<2x32xf32>
    %80 = arith.mulf %79, %77 : vector<2x32xf32>
    %81 = arith.mulf %70, %57 : vector<2x32xf32>
    %82 = arith.addf %80, %81 : vector<2x32xf32>
    %c4 = arith.constant 4 : index
    %c0_23 = arith.constant 0 : index
    %83 = vector.load %arg10[%c4, %c0_23] : memref<16x32xf32, #tpu.memory_space<vmem>>, vector<2x32xf32>
    tpu.vector_store %arg10[%c4, %c0_23], %82 {strides = array<i32>} : memref<16x32xf32, #tpu.memory_space<vmem>>, vector<2x32xf32>,
    %84 = vector.extract_strided_slice %5 {offsets = [6, 0], sizes = [2, 96], strides = [1, 1]} : vector<16x96xf32> to vector<2x96xf32>
    %cst_24 = arith.constant dense<0.000000e+00> : vector<2x96xf32>
    %85 = tpu.matmul %82, %6, %cst_24 {dimension_numbers = #tpu.dot_dimension_numbers<[1], [0], [0], [1], [0, 0, 1, 1], [], []>} : vector<2x32xf32>, vector<32x96xf32>, vector<2x96xf32> -> vector<2x96xf32>
    %86 = vector.extract_strided_slice %84 {offsets = [0, 0], sizes = [2, 64], strides = [1, 1]} : vector<2x96xf32> to vector<2x64xf32>
    %87 = vector.extract_strided_slice %85 {offsets = [0, 0], sizes = [2, 64], strides = [1, 1]} : vector<2x96xf32> to vector<2x64xf32>
    %88 = arith.addf %86, %87 : vector<2x64xf32>
    %89 = arith.negf %88 : vector<2x64xf32>
    %90 = math.exp %89 : vector<2x64xf32>
    %cst_25 = arith.constant 1.000000e+00 : f32
    %91 = vector.broadcast %cst_25 : f32 to vector<2x64xf32>
    %92 = arith.addf %91, %90 : vector<2x64xf32>
    %93 = arith.divf %91, %92 : vector<2x64xf32>
    %94 = vector.extract_strided_slice %93 {offsets = [0, 0], sizes = [2, 32], strides = [1, 1]} : vector<2x64xf32> to vector<2x32xf32>
    %95 = vector.extract_strided_slice %93 {offsets = [0, 32], sizes = [2, 32], strides = [1, 1]} : vector<2x64xf32> to vector<2x32xf32>
    %96 = vector.extract_strided_slice %84 {offsets = [0, 64], sizes = [2, 32], strides = [1, 1]} : vector<2x96xf32> to vector<2x32xf32>
    %97 = vector.extract_strided_slice %85 {offsets = [0, 64], sizes = [2, 32], strides = [1, 1]} : vector<2x96xf32> to vector<2x32xf32>
    %98 = vector.broadcast %7 : vector<1x32xf32> to vector<2x32xf32>
    %99 = arith.addf %97, %98 : vector<2x32xf32>
    %100 = arith.mulf %94, %99 : vector<2x32xf32>
    %101 = arith.addf %96, %100 : vector<2x32xf32>
    %102 = math.tanh %101 : vector<2x32xf32>
    %cst_26 = arith.constant 1.000000e+00 : f32
    %103 = vector.broadcast %cst_26 : f32 to vector<2x32xf32>
    %104 = arith.subf %103, %95 : vector<2x32xf32>
    %105 = arith.mulf %104, %102 : vector<2x32xf32>
    %106 = arith.mulf %95, %82 : vector<2x32xf32>
    %107 = arith.addf %105, %106 : vector<2x32xf32>
    %c6 = arith.constant 6 : index
    %c0_27 = arith.constant 0 : index
    %108 = vector.load %arg10[%c6, %c0_27] : memref<16x32xf32, #tpu.memory_space<vmem>>, vector<2x32xf32>
    tpu.vector_store %arg10[%c6, %c0_27], %107 {strides = array<i32>} : memref<16x32xf32, #tpu.memory_space<vmem>>, vector<2x32xf32>,
    %109 = vector.extract_strided_slice %5 {offsets = [8, 0], sizes = [2, 96], strides = [1, 1]} : vector<16x96xf32> to vector<2x96xf32>
    %cst_28 = arith.constant dense<0.000000e+00> : vector<2x96xf32>
    %110 = tpu.matmul %107, %6, %cst_28 {dimension_numbers = #tpu.dot_dimension_numbers<[1], [0], [0], [1], [0, 0, 1, 1], [], []>} : vector<2x32xf32>, vector<32x96xf32>, vector<2x96xf32> -> vector<2x96xf32>
    %111 = vector.extract_strided_slice %109 {offsets = [0, 0], sizes = [2, 64], strides = [1, 1]} : vector<2x96xf32> to vector<2x64xf32>
    %112 = vector.extract_strided_slice %110 {offsets = [0, 0], sizes = [2, 64], strides = [1, 1]} : vector<2x96xf32> to vector<2x64xf32>
    %113 = arith.addf %111, %112 : vector<2x64xf32>
    %114 = arith.negf %113 : vector<2x64xf32>
    %115 = math.exp %114 : vector<2x64xf32>
    %cst_29 = arith.constant 1.000000e+00 : f32
    %116 = vector.broadcast %cst_29 : f32 to vector<2x64xf32>
    %117 = arith.addf %116, %115 : vector<2x64xf32>
    %118 = arith.divf %116, %117 : vector<2x64xf32>
    %119 = vector.extract_strided_slice %118 {offsets = [0, 0], sizes = [2, 32], strides = [1, 1]} : vector<2x64xf32> to vector<2x32xf32>
    %120 = vector.extract_strided_slice %118 {offsets = [0, 32], sizes = [2, 32], strides = [1, 1]} : vector<2x64xf32> to vector<2x32xf32>
    %121 = vector.extract_strided_slice %109 {offsets = [0, 64], sizes = [2, 32], strides = [1, 1]} : vector<2x96xf32> to vector<2x32xf32>
    %122 = vector.extract_strided_slice %110 {offsets = [0, 64], sizes = [2, 32], strides = [1, 1]} : vector<2x96xf32> to vector<2x32xf32>
    %123 = vector.broadcast %7 : vector<1x32xf32> to vector<2x32xf32>
    %124 = arith.addf %122, %123 : vector<2x32xf32>
    %125 = arith.mulf %119, %124 : vector<2x32xf32>
    %126 = arith.addf %121, %125 : vector<2x32xf32>
    %127 = math.tanh %126 : vector<2x32xf32>
    %cst_30 = arith.constant 1.000000e+00 : f32
    %128 = vector.broadcast %cst_30 : f32 to vector<2x32xf32>
    %129 = arith.subf %128, %120 : vector<2x32xf32>
    %130 = arith.mulf %129, %127 : vector<2x32xf32>
    %131 = arith.mulf %120, %107 : vector<2x32xf32>
    %132 = arith.addf %130, %131 : vector<2x32xf32>
    %c8 = arith.constant 8 : index
    %c0_31 = arith.constant 0 : index
    %133 = vector.load %arg10[%c8, %c0_31] : memref<16x32xf32, #tpu.memory_space<vmem>>, vector<2x32xf32>
    tpu.vector_store %arg10[%c8, %c0_31], %132 {strides = array<i32>} : memref<16x32xf32, #tpu.memory_space<vmem>>, vector<2x32xf32>,
    %134 = vector.extract_strided_slice %5 {offsets = [10, 0], sizes = [2, 96], strides = [1, 1]} : vector<16x96xf32> to vector<2x96xf32>
    %cst_32 = arith.constant dense<0.000000e+00> : vector<2x96xf32>
    %135 = tpu.matmul %132, %6, %cst_32 {dimension_numbers = #tpu.dot_dimension_numbers<[1], [0], [0], [1], [0, 0, 1, 1], [], []>} : vector<2x32xf32>, vector<32x96xf32>, vector<2x96xf32> -> vector<2x96xf32>
    %136 = vector.extract_strided_slice %134 {offsets = [0, 0], sizes = [2, 64], strides = [1, 1]} : vector<2x96xf32> to vector<2x64xf32>
    %137 = vector.extract_strided_slice %135 {offsets = [0, 0], sizes = [2, 64], strides = [1, 1]} : vector<2x96xf32> to vector<2x64xf32>
    %138 = arith.addf %136, %137 : vector<2x64xf32>
    %139 = arith.negf %138 : vector<2x64xf32>
    %140 = math.exp %139 : vector<2x64xf32>
    %cst_33 = arith.constant 1.000000e+00 : f32
    %141 = vector.broadcast %cst_33 : f32 to vector<2x64xf32>
    %142 = arith.addf %141, %140 : vector<2x64xf32>
    %143 = arith.divf %141, %142 : vector<2x64xf32>
    %144 = vector.extract_strided_slice %143 {offsets = [0, 0], sizes = [2, 32], strides = [1, 1]} : vector<2x64xf32> to vector<2x32xf32>
    %145 = vector.extract_strided_slice %143 {offsets = [0, 32], sizes = [2, 32], strides = [1, 1]} : vector<2x64xf32> to vector<2x32xf32>
    %146 = vector.extract_strided_slice %134 {offsets = [0, 64], sizes = [2, 32], strides = [1, 1]} : vector<2x96xf32> to vector<2x32xf32>
    %147 = vector.extract_strided_slice %135 {offsets = [0, 64], sizes = [2, 32], strides = [1, 1]} : vector<2x96xf32> to vector<2x32xf32>
    %148 = vector.broadcast %7 : vector<1x32xf32> to vector<2x32xf32>
    %149 = arith.addf %147, %148 : vector<2x32xf32>
    %150 = arith.mulf %144, %149 : vector<2x32xf32>
    %151 = arith.addf %146, %150 : vector<2x32xf32>
    %152 = math.tanh %151 : vector<2x32xf32>
    %cst_34 = arith.constant 1.000000e+00 : f32
    %153 = vector.broadcast %cst_34 : f32 to vector<2x32xf32>
    %154 = arith.subf %153, %145 : vector<2x32xf32>
    %155 = arith.mulf %154, %152 : vector<2x32xf32>
    %156 = arith.mulf %145, %132 : vector<2x32xf32>
    %157 = arith.addf %155, %156 : vector<2x32xf32>
    %c10 = arith.constant 10 : index
    %c0_35 = arith.constant 0 : index
    %158 = vector.load %arg10[%c10, %c0_35] : memref<16x32xf32, #tpu.memory_space<vmem>>, vector<2x32xf32>
    tpu.vector_store %arg10[%c10, %c0_35], %157 {strides = array<i32>} : memref<16x32xf32, #tpu.memory_space<vmem>>, vector<2x32xf32>,
    %159 = vector.extract_strided_slice %5 {offsets = [12, 0], sizes = [2, 96], strides = [1, 1]} : vector<16x96xf32> to vector<2x96xf32>
    %cst_36 = arith.constant dense<0.000000e+00> : vector<2x96xf32>
    %160 = tpu.matmul %157, %6, %cst_36 {dimension_numbers = #tpu.dot_dimension_numbers<[1], [0], [0], [1], [0, 0, 1, 1], [], []>} : vector<2x32xf32>, vector<32x96xf32>, vector<2x96xf32> -> vector<2x96xf32>
    %161 = vector.extract_strided_slice %159 {offsets = [0, 0], sizes = [2, 64], strides = [1, 1]} : vector<2x96xf32> to vector<2x64xf32>
    %162 = vector.extract_strided_slice %160 {offsets = [0, 0], sizes = [2, 64], strides = [1, 1]} : vector<2x96xf32> to vector<2x64xf32>
    %163 = arith.addf %161, %162 : vector<2x64xf32>
    %164 = arith.negf %163 : vector<2x64xf32>
    %165 = math.exp %164 : vector<2x64xf32>
    %cst_37 = arith.constant 1.000000e+00 : f32
    %166 = vector.broadcast %cst_37 : f32 to vector<2x64xf32>
    %167 = arith.addf %166, %165 : vector<2x64xf32>
    %168 = arith.divf %166, %167 : vector<2x64xf32>
    %169 = vector.extract_strided_slice %168 {offsets = [0, 0], sizes = [2, 32], strides = [1, 1]} : vector<2x64xf32> to vector<2x32xf32>
    %170 = vector.extract_strided_slice %168 {offsets = [0, 32], sizes = [2, 32], strides = [1, 1]} : vector<2x64xf32> to vector<2x32xf32>
    %171 = vector.extract_strided_slice %159 {offsets = [0, 64], sizes = [2, 32], strides = [1, 1]} : vector<2x96xf32> to vector<2x32xf32>
    %172 = vector.extract_strided_slice %160 {offsets = [0, 64], sizes = [2, 32], strides = [1, 1]} : vector<2x96xf32> to vector<2x32xf32>
    %173 = vector.broadcast %7 : vector<1x32xf32> to vector<2x32xf32>
    %174 = arith.addf %172, %173 : vector<2x32xf32>
    %175 = arith.mulf %169, %174 : vector<2x32xf32>
    %176 = arith.addf %171, %175 : vector<2x32xf32>
    %177 = math.tanh %176 : vector<2x32xf32>
    %cst_38 = arith.constant 1.000000e+00 : f32
    %178 = vector.broadcast %cst_38 : f32 to vector<2x32xf32>
    %179 = arith.subf %178, %170 : vector<2x32xf32>
    %180 = arith.mulf %179, %177 : vector<2x32xf32>
    %181 = arith.mulf %170, %157 : vector<2x32xf32>
    %182 = arith.addf %180, %181 : vector<2x32xf32>
    %c12 = arith.constant 12 : index
    %c0_39 = arith.constant 0 : index
    %183 = vector.load %arg10[%c12, %c0_39] : memref<16x32xf32, #tpu.memory_space<vmem>>, vector<2x32xf32>
    tpu.vector_store %arg10[%c12, %c0_39], %182 {strides = array<i32>} : memref<16x32xf32, #tpu.memory_space<vmem>>, vector<2x32xf32>,
    %184 = vector.extract_strided_slice %5 {offsets = [14, 0], sizes = [2, 96], strides = [1, 1]} : vector<16x96xf32> to vector<2x96xf32>
    %cst_40 = arith.constant dense<0.000000e+00> : vector<2x96xf32>
    %185 = tpu.matmul %182, %6, %cst_40 {dimension_numbers = #tpu.dot_dimension_numbers<[1], [0], [0], [1], [0, 0, 1, 1], [], []>} : vector<2x32xf32>, vector<32x96xf32>, vector<2x96xf32> -> vector<2x96xf32>
    %186 = vector.extract_strided_slice %184 {offsets = [0, 0], sizes = [2, 64], strides = [1, 1]} : vector<2x96xf32> to vector<2x64xf32>
    %187 = vector.extract_strided_slice %185 {offsets = [0, 0], sizes = [2, 64], strides = [1, 1]} : vector<2x96xf32> to vector<2x64xf32>
    %188 = arith.addf %186, %187 : vector<2x64xf32>
    %189 = arith.negf %188 : vector<2x64xf32>
    %190 = math.exp %189 : vector<2x64xf32>
    %cst_41 = arith.constant 1.000000e+00 : f32
    %191 = vector.broadcast %cst_41 : f32 to vector<2x64xf32>
    %192 = arith.addf %191, %190 : vector<2x64xf32>
    %193 = arith.divf %191, %192 : vector<2x64xf32>
    %194 = vector.extract_strided_slice %193 {offsets = [0, 0], sizes = [2, 32], strides = [1, 1]} : vector<2x64xf32> to vector<2x32xf32>
    %195 = vector.extract_strided_slice %193 {offsets = [0, 32], sizes = [2, 32], strides = [1, 1]} : vector<2x64xf32> to vector<2x32xf32>
    %196 = vector.extract_strided_slice %184 {offsets = [0, 64], sizes = [2, 32], strides = [1, 1]} : vector<2x96xf32> to vector<2x32xf32>
    %197 = vector.extract_strided_slice %185 {offsets = [0, 64], sizes = [2, 32], strides = [1, 1]} : vector<2x96xf32> to vector<2x32xf32>
    %198 = vector.broadcast %7 : vector<1x32xf32> to vector<2x32xf32>
    %199 = arith.addf %197, %198 : vector<2x32xf32>
    %200 = arith.mulf %194, %199 : vector<2x32xf32>
    %201 = arith.addf %196, %200 : vector<2x32xf32>
    %202 = math.tanh %201 : vector<2x32xf32>
    %cst_42 = arith.constant 1.000000e+00 : f32
    %203 = vector.broadcast %cst_42 : f32 to vector<2x32xf32>
    %204 = arith.subf %203, %195 : vector<2x32xf32>
    %205 = arith.mulf %204, %202 : vector<2x32xf32>
    %206 = arith.mulf %195, %182 : vector<2x32xf32>
    %207 = arith.addf %205, %206 : vector<2x32xf32>
    %c14 = arith.constant 14 : index
    %c0_43 = arith.constant 0 : index
    %208 = vector.load %arg10[%c14, %c0_43] : memref<16x32xf32, #tpu.memory_space<vmem>>, vector<2x32xf32>
    tpu.vector_store %arg10[%c14, %c0_43], %207 {strides = array<i32>} : memref<16x32xf32, #tpu.memory_space<vmem>>, vector<2x32xf32>,
    %c0_44 = arith.constant 0 : index
    %c0_45 = arith.constant 0 : index
    %209 = vector.load %arg10[%c0_44, %c0_45] : memref<16x32xf32, #tpu.memory_space<vmem>>, vector<16x32xf32>
    %c0_46 = arith.constant 0 : index
    %c0_47 = arith.constant 0 : index
    %210 = vector.load %arg6[%c0_46, %c0_47] : memref<32x3xf32, #tpu.memory_space<vmem>>, vector<32x3xf32>
    %cst_48 = arith.constant dense<0.000000e+00> : vector<16x3xf32>
    %211 = tpu.matmul %209, %210, %cst_48 {dimension_numbers = #tpu.dot_dimension_numbers<[1], [0], [0], [1], [0, 0, 1, 1], [], []>} : vector<16x32xf32>, vector<32x3xf32>, vector<16x3xf32> -> vector<16x3xf32>
    %c0_49 = arith.constant 0 : index
    %c0_50 = arith.constant 0 : index
    %212 = vector.load %arg7[%c0_49, %c0_50] : memref<1x3xf32, #tpu.memory_space<vmem>>, vector<1x3xf32>
    %213 = vector.broadcast %212 : vector<1x3xf32> to vector<16x3xf32>
    %214 = arith.addf %211, %213 : vector<16x3xf32>
    %c0_51 = arith.constant 0 : index
    %c0_52 = arith.constant 0 : index
    %215 = vector.load %arg8[%c0_51, %c0_52] : memref<16x3xf32, #tpu.memory_space<vmem>>, vector<16x3xf32>
    tpu.vector_store %arg8[%c0_51, %c0_52], %214 {strides = array<i32>} : memref<16x3xf32, #tpu.memory_space<vmem>>, vector<16x3xf32>,
    %c0_53 = arith.constant 0 : index
    %c0_54 = arith.constant 0 : index
    %216 = vector.load %arg9[%c0_53, %c0_54] : memref<2x32xf32, #tpu.memory_space<vmem>>, vector<2x32xf32>
    tpu.vector_store %arg9[%c0_53, %c0_54], %207 {strides = array<i32>} : memref<2x32xf32, #tpu.memory_space<vmem>>, vector<2x32xf32>,
    return
  }
}

</mosaic_0001>

<bundles_post_ra>
// kernel: language_detector_forward.1
= control target key start
LH: loop header
LB: loop body
LE: loop exit
PB: predicated region body
PF: predicated region fallthrough
CT: control target
= control target key end

     0   :  { %15 = vsyncpa [#allocation4], 0  ;;  %s1771_s0 = inlined_call_operand.vmem [shape: f32[16,64], index: 0, kind: input, shape index: {}]   ;;  %s1772_s1 = inlined_call_operand.vmem [shape: f32[2,32], index: 1, kind: input, shape index: {}, may-alias: {1,9}]   ;;  %s1773_s2 = inlined_call_operand.hbm [shape: f32[64,96], index: 2, kind: input, shape index: {}]   ;;  %s1774_s3 = inlined_call_operand.vmem [shape: f32[1,96], index: 3, kind: input, shape index: {}]   ;;  %s1775_s4 = inlined_call_operand.hbm [shape: f32[32,96], index: 4, kind: input, shape index: {}]   ;;  %s1776_s5 = inlined_call_operand.vmem [shape: f32[1,32], index: 5, kind: input, shape index: {}]   ;;  %s1777_s6 = inlined_call_operand.vmem [shape: f32[32,3], index: 6, kind: input, shape index: {}]   ;;  %s1778_s7 = inlined_call_operand.vmem [shape: f32[1,3], index: 7, kind: input, shape index: {}]   ;;  %s1779_s8 = inlined_call_operand.vmem [shape: f32[16,3], index: 8, kind: output, shape index: {0}]   ;;  %s1780_s9 = inlined_call_operand.vmem [shape: f32[2,32], index: 9, kind: output, shape index: {1}, may-alias: {1,9}]  }
   0x1   :  { %16 = vsyncpa [#allocation6], 0  ;;  %s1471_s30 = smov [#allocation3]  }
   0x2   :  { %s26_s10 = sshll.u32 %s1471_s30, 4  ;;  %s27_s10 = int_to_ptr.vmem [resolvable:$true] %s26_s10 }
   0x3   :  { %s1435_s11 = scalar_lea.vmem %s27_s10, 1024  ;;  %p1440_p1 = scmp.lt.s32.totalorder %s27_s10, %s27_s10 }
   0x4   :  { %p1436_p0 = scmp.ne.s32.totalorder %s27_s10, %s1435_s11  ;;  %p1441_p2 = scmp.lt.s32.totalorder %s1435_s11, %s1435_s11 }
   0x6   :  { %p1442_p3 = por %p1441_p2, %p1440_p1 }
   0x8   :  { %p1443_p4 = pnand %p1442_p3, %p1436_p0 }
   0xa   :  { %1446 = shalt.err (!%p1443_p4)
}
   0xb   :  { %s1472_s12 = smov 128   ;;  %s1473_s13 = smov 8  }
   0xc   :  { %32 = dma.hbm_to_vmem [thread:$0]  %s1773_s2, 1024, %s27_s10, [#allocation4], %s1472_s12, %s1472_s12, %s1473_s13  }
   0xd   :  { %s1474_s16 = smov [#allocation5]  }
   0xe   :  { %s40_s17 = sshll.u32 %s1474_s16, 4  ;;  %s41_s17 = int_to_ptr.vmem [resolvable:$true] %s40_s17 }
   0xf   :  { %s1455_s18 = scalar_lea.vmem %s41_s17, 512  ;;  %p1460_p6 = scmp.lt.s32.totalorder %s41_s17, %s41_s17 }
  0x10   :  { %p1456_p5 = scmp.ne.s32.totalorder %s41_s17, %s1455_s18  ;;  %p1461_p7 = scmp.lt.s32.totalorder %s1455_s18, %s1455_s18 }
  0x12   :  { %p1462_p8 = por %p1461_p7, %p1460_p6 }
  0x14   :  { %p1463_p9 = pnand %p1462_p8, %p1456_p5 }
  0x16   :  { %1466 = shalt.err (!%p1463_p9)
}
  0x17   :  { %46 = dma.hbm_to_vmem [thread:$0]  %s1775_s4, 512, %s41_s17, [#allocation6], %s1472_s12, %s1472_s12, %s1473_s13  }
  0x18   :  { %1467 = dma.done.wait [#allocation4], 1024  }
  0x19   :  { %1468 = vsyncadd [#allocation4], 4294966272 }
  0x1a   :  { %1469 = dma.done.wait [#allocation6], 512  }
  0x1b   :  { %1470 = vsyncadd [#allocation6], 4294966784  ;;  %v1475_v0 = vmov 0.0   ;;  %vm1476_vm0 = vmmov 0   ;;  %v68_v1 = vld [vmem:[#allocation3 + $0x38] sm:$0xff]  ;;  %v67_v3 = vld [vmem:[#allocation3 + $0x30] sm:$0xff] }
  0x1c   :  { %1271 = vmatprep.subr.mxu1 %v1475_v0  ;;  %1279 = vmatprep.mubr.msk.f32.mxu1 %vm1476_vm0, %v1475_v0  ;;  %v1539_v2 = vld [vmem:[#allocation5 + $0x18] sm:$0xff]  ;;  %v1542_v4 = vld [vmem:[#allocation5 + $0x10] sm:$0xff]  ;;  %v66_v5 = vld [vmem:[#allocation3 + $0x28] sm:$0xff]  ;;  %vm164_vm1 = vcmask 261120   ;;  %vm76_vm2 = vcmask 523264   ;;  %vm280_vm3 = vcmask 254976  }
  0x1d   :  { %1252 = vmatprep.subr.mxu0 %v68_v1  ;;  %1272 = vmatpush3.msra.mxu1 %v1539_v2  ;;  %v1545_v6 = vld [vmem:[#allocation5 + $0x8] sm:$0xff]  ;;  %v65_v7 = vld [vmem:[#allocation3 + $0x20] sm:$0xff]  ;;  %v163_v9 = vld [vmem:[%s1772_s1] sm:$0x3]  ;;  %s1477_s1 = smov 64   ;;  %vm391_vm4 = vcmask 257026  }
  0x1e   :  { %1253 = vmatpush3.msra.mxu0 %v68_v1  ;;  %1273 = vmatprep.subr.mxu1 %v1475_v0  ;;  %v1549_v8 = vld [vmem:[#allocation5] sm:$0xff]  ;;  %v64_v10 = vld [vmem:[#allocation3 + $0x18] sm:$0xff]  ;;  %v59_v11 = vld [vmem:[%s1771_s0] sm:$0xff]  ;;  %vm619_vm5 = vcmask 261126   ;;  %vm505_vm6 = vcmask 259076   ;;  %vm1159_vm7 = vcmask 23552  }
  0x1f   :  { %1254 = vmatprep.subr.mxu0 %v67_v3  ;;  %1274 = vmatpush3.msra.mxu1 %v1542_v4  ;;  %v1178_v12 = vld [vmem:[%s1776_s5] ss:$0 sm:$0xff]  ;;  %v62_v14 = vld [vmem:[#allocation3 + $0x8] sm:$0xff]  ;;  %v61_v15 = vld [vmem:[#allocation3] sm:$0xff] }
  0x20   :  { %1255 = vmatpush3.msra.mxu0 %v67_v3  ;;  %1275 = vmatprep.subr.mxu1 %v1475_v0  ;;  %v63_v13 = vld [vmem:[#allocation3 + $0x10] sm:$0xff]  ;;  %v60_v16 = vld [vmem:[%s1771_s0 + $0x8] sm:$0xff]  ;;  %s1478_s0 = smov 32  }
  0x21   :  { %1256 = vmatprep.subr.mxu0 %v66_v5  ;;  %1276 = vmatpush3.msra.mxu1 %v1545_v6  ;;  %v1173_v22 = vld [vmem:[%s1774_s3] ss:$0 sm:$0xff]  ;;  %s1479_s3 = smov 96  }
  0x22   :  { %1257 = vmatpush3.msra.mxu0 %v66_v5  ;;  %1277 = vmatprep.subr.mxu1 %v1475_v0 }
  0x23   :  { %1258 = vmatprep.subr.mxu0 %v65_v7  ;;  %1278 = vmatpush3.msra.mxu1 %v1549_v8 }
  0x24   :  { %1259 = vmatpush3.msra.mxu0 %v65_v7  ;;  %1280 = vmatmul.mubr.msk.f32.vlgmr.msra.gmra.mxu1 %vm164_vm1, %v163_v9 }
  0x25   :  { %1260 = vmatprep.subr.mxu0 %v64_v10  ;;  %1268 = vmatprep.mubr.msk.f32.mxu0 %vm76_vm2, %v59_v11 }
  0x26   :  { %1261 = vmatpush3.msra.mxu0 %v64_v10  ;;  %250 = vrot.lane.b32.xlu0 %v1178_v12, %s1477_s1 }
  0x27   :  { %1262 = vmatprep.subr.mxu0 %v63_v13  ;;  %1282 = vmatprep.subr.mxu1 %v1475_v0 }
  0x28   :  { %1263 = vmatpush3.msra.mxu0 %v63_v13  ;;  %1283 = vmatpush3.msra.mxu1 %v1539_v2 }
  0x29   :  { %1264 = vmatprep.subr.mxu0 %v62_v14  ;;  %1284 = vmatprep.subr.mxu1 %v1475_v0 }
  0x2a   :  { %1265 = vmatpush3.msra.mxu0 %v62_v14  ;;  %1285 = vmatpush3.msra.mxu1 %v1542_v4 }
  0x2b   :  { %1266 = vmatprep.subr.mxu0 %v61_v15  ;;  %1286 = vmatprep.subr.mxu1 %v1475_v0 }
  0x2c   :  { %1267 = vmatpush3.msra.mxu0 %v61_v15  ;;  %1287 = vmatpush3.msra.mxu1 %v1545_v6 }
  0x2d   :  { %1269 = vmatmul.mubr.msk.f32.vlgmr.msra.gmra.mxu0 %vm76_vm2, %v60_v16  ;;  %1288 = vmatprep.subr.mxu1 %v1475_v0 }
  0x2e   :  { %1289 = vmatpush3.msra.mxu1 %v1549_v8  ;;  %1290 = vmatprep.mubr.msk.f32.mxu1 %vm1476_vm0, %v1475_v0 }
  0x2f   :  { %1293 = vmatprep.subr.mxu0 %v1475_v0  ;;  %1301 = vmatprep.mubr.msk.f32.mxu0 %vm1476_vm0, %v1475_v0 }
  0x30   :  { %1294 = vmatpush3.msra.mxu0 %v1539_v2  ;;  %1304 = vmatprep.subr.mxu1 %v1475_v0 }
  0x31   :  { %1295 = vmatprep.subr.mxu0 %v1475_v0 }
  0x32   :  { %1296 = vmatpush3.msra.mxu0 %v1542_v4 }
  0x33   :  { %1297 = vmatprep.subr.mxu0 %v1475_v0 }
  0x34   :  { %1298 = vmatpush3.msra.mxu0 %v1545_v6 }
  0x35   :  { %1299 = vmatprep.subr.mxu0 %v1475_v0 }
  0x36   :  { %1300 = vmatpush3.msra.mxu0 %v1549_v8 }
  0x37   :  { %1315 = vmatprep.subr.mxu0 %v1475_v0 }
  0x98   :  { %v1592_v17 = vpop.permute.xlu0 %250 }
  0xe4   :  { %v234_v18 = vpop.f32.mrf.mxu1 }
  0xe5   :  { %v253_v19 = vadd.f32 %v1592_v17, %v234_v18 }
  0xe6   :  { %v1281_v20 = vpop.f32.mrf.mxu1 }
  0xe7   :  { %255 = vrot.lane.b32.xlu0 %v253_v19, %s1477_s1 }
  0xeb   :  { %271 = vrot.lane.b32.xlu0 %v163_v9, %s1478_s0 }
  0xed   :  { %v1270_v21 = vpop.f32.mrf.mxu0 }
  0xee   :  { %v1599_v23 = vadd.f32 %v1270_v21, %v1173_v22 }
  0xef   :  { %v149_v24 = vpop.f32.mrf.mxu0 }
  0xf0   :  { %v1601_v25 = vadd.f32 %v1173_v22, %v149_v24 }
  0xf2   :  { %v238_v26 = vadd.f32 %v234_v18, %v1601_v25 }
  0xf4   :  { %v1177_v27 = vmul.f32 -1.442695, %v238_v26 }
  0xf6   :  { %1379 = vpow2.f32 %v1177_v27 }
 0x103   :  { %v1380_v28 = vpop.eup %1379 }
 0x104   :  { %v242_v29 = vadd.f32 1.0, %v1380_v28 }
 0x106   :  { %1381 = vrcp.f32 %v242_v29 }
 0x113   :  { %v1382_v30 = vpop.eup %1381 }
 0x114   :  { %v265_v37 = vsub.f32 1.0, %v1382_v30 }
 0x159   :  { %v256_v31 = vpop.permute.xlu0 %255 }
 0x15a   :  { %v258_v32 = vmul.f32 %v1382_v30, %v256_v31 }
 0x15c   :  { %260 = vrot.lane.b32.xlu1 %v258_v32, %s1477_s1 }
 0x15d   :  { %v272_v36 = vpop.permute.xlu0 %271 }
 0x15e   :  { %v274_v39 = vmul.f32 %v1382_v30, %v272_v36 }
 0x1ce   :  { %v261_v33 = vpop.permute.xlu1 %260 }
 0x1cf   :  { %v263_v34 = vadd.f32 %v261_v33, %v1601_v25 }
 0x1d1   :  { %1383 = vtanh.f32 %v263_v34 }
 0x1de   :  { %v1384_v35 = vpop.eup %1383 }
 0x1df   :  { %267 = vrot.lane.b32.xlu1 %v1384_v35, %s1479_s3 }
 0x251   :  { %v268_v38 = vpop.permute.xlu1 %267 }
 0x252   :  { %v270_v40 = vmul.f32 %v268_v38, %v265_v37 }
 0x254   :  { %v275_v41 = vadd.f32 %v274_v39, %v270_v40 }
 0x256   :  { %277 = vrot.lane.b32.xlu1 %v275_v41, %s1479_s3  ;;  %v383_v58 = vrot.slane %v275_v41, 6 }
 0x2c8   :  { %v278_v42 = vpop.permute.xlu1 %277 }
 0x2c9   :  { %281 = vst.msk [vmem:[#allocation2] sm:$0x3] %vm280_vm3, %v278_v42  ;;  %1291 = vmatmul.mubr.msk.f32.vlgmr.msra.gmra.mxu1 %vm164_vm1, %v278_v42 }
 0x2ca   :  { %1305 = vmatpush3.msra.mxu1 %v1539_v2  ;;  %1312 = vmatprep.mubr.msk.f32.mxu1 %vm1476_vm0, %v1475_v0 }
 0x2cb   :  { %1306 = vmatprep.subr.mxu1 %v1475_v0 }
 0x2cc   :  { %1307 = vmatpush3.msra.mxu1 %v1542_v4 }
 0x2cd   :  { %1308 = vmatprep.subr.mxu1 %v1475_v0 }
 0x2ce   :  { %1309 = vmatpush3.msra.mxu1 %v1545_v6 }
 0x2cf   :  { %1310 = vmatprep.subr.mxu1 %v1475_v0 }
 0x2d0   :  { %1311 = vmatpush3.msra.mxu1 %v1549_v8 }
 0x2d1   :  { %1326 = vmatprep.subr.mxu1 %v1475_v0 }
 0x389   :  { %v350_v43 = vpop.f32.mrf.mxu1 }
 0x38a   :  { %v364_v44 = vadd.f32 %v350_v43, %v1592_v17  ;;  %v355_v47 = vrot.slane %v350_v43, 6 }
 0x38b   :  { %v1292_v45 = vpop.f32.mrf.mxu1 }
 0x38c   :  { %v366_v46 = vrot.slane %v364_v44, 6  ;;  %v357_v48 = vadd.f32 %v355_v47, %v1601_v25 }
 0x38e   :  { %367 = vrot.lane.b32.xlu0 %v366_v46, %s1477_s1  ;;  %v1180_v49 = vmul.f32 -1.442695, %v357_v48 }
 0x390   :  { %1385 = vpow2.f32 %v1180_v49 }
 0x39d   :  { %v1386_v50 = vpop.eup %1385 }
 0x39e   :  { %v361_v51 = vadd.f32 1.0, %v1386_v50 }
 0x3a0   :  { %1387 = vrcp.f32 %v361_v51 }
 0x3ad   :  { %v1388_v52 = vpop.eup %1387 }
 0x3ae   :  { %v377_v59 = vsub.f32 1.0, %v1388_v52  ;;  %v385_v62 = vmul.f32 %v1388_v52, %v383_v58 }
 0x400   :  { %v368_v53 = vpop.permute.xlu0 %367 }
 0x401   :  { %v370_v54 = vmul.f32 %v1388_v52, %v368_v53 }
 0x403   :  { %372 = vrot.lane.b32.xlu1 %v370_v54, %s1477_s1 }
 0x475   :  { %v373_v55 = vpop.permute.xlu1 %372 }
 0x476   :  { %v375_v56 = vadd.f32 %v373_v55, %v1601_v25 }
 0x478   :  { %1389 = vtanh.f32 %v375_v56 }
 0x485   :  { %v1390_v57 = vpop.eup %1389 }
 0x486   :  { %379 = vrot.lane.b32.xlu0 %v1390_v57, %s1479_s3 }
 0x4f8   :  { %v380_v60 = vpop.permute.xlu0 %379 }
 0x4f9   :  { %v382_v61 = vmul.f32 %v380_v60, %v377_v59 }
 0x4fb   :  { %v1626_v63 = vadd.f32 %v385_v62, %v382_v61 }
 0x4fd   :  { %v393_v1 = vrot.slane %v1626_v63, 2  ;;  %v497_v26 = vrot.slane %v1626_v63, 6 }
 0x4ff   :  { %394 = vrot.lane.b32.xlu1 %v393_v1, %s1479_s3 }
 0x571   :  { %v395_v3 = vpop.permute.xlu1 %394 }
 0x572   :  { %1302 = vmatmul.mubr.msk.f32.vlgmr.msra.gmra.mxu0 %vm164_vm1, %v395_v3 }
 0x573   :  { %1316 = vmatpush3.msra.mxu0 %v1539_v2  ;;  %1323 = vmatprep.mubr.msk.f32.mxu0 %vm1476_vm0, %v1475_v0 }
 0x574   :  { %1317 = vmatprep.subr.mxu0 %v1475_v0 }
 0x575   :  { %1318 = vmatpush3.msra.mxu0 %v1542_v4 }
 0x576   :  { %1319 = vmatprep.subr.mxu0 %v1475_v0 }
 0x577   :  { %1320 = vmatpush3.msra.mxu0 %v1545_v6 }
 0x578   :  { %1321 = vmatprep.subr.mxu0 %v1475_v0 }
 0x579   :  { %1322 = vmatpush3.msra.mxu0 %v1549_v8 }
 0x57a   :  { %1337 = vmatprep.subr.mxu0 %v1475_v0 }
 0x632   :  { %v464_v5 = vpop.f32.mrf.mxu0 }
 0x633   :  { %v478_v7 = vadd.f32 %v464_v5, %v1592_v17  ;;  %v469_v11 = vrot.slane %v464_v5, 4 }
 0x634   :  { %v1303_v9 = vpop.f32.mrf.mxu0 }
 0x635   :  { %v480_v10 = vrot.slane %v478_v7, 4  ;;  %v471_v12 = vadd.f32 %v469_v11, %v1601_v25 }
 0x637   :  { %481 = vrot.lane.b32.xlu0 %v480_v10, %s1477_s1  ;;  %v1182_v13 = vmul.f32 -1.442695, %v471_v12 }
 0x639   :  { %1391 = vpow2.f32 %v1182_v13 }
 0x646   :  { %v1392_v14 = vpop.eup %1391 }
 0x647   :  { %v475_v15 = vadd.f32 1.0, %v1392_v14 }
 0x649   :  { %1393 = vrcp.f32 %v475_v15 }
 0x656   :  { %v1394_v16 = vpop.eup %1393 }
 0x657   :  { %v491_v24 = vsub.f32 1.0, %v1394_v16  ;;  %v499_v28 = vmul.f32 %v1394_v16, %v497_v26 }
 0x6a9   :  { %v482_v18 = vpop.permute.xlu0 %481 }
 0x6aa   :  { %v484_v19 = vmul.f32 %v1394_v16, %v482_v18 }
 0x6ac   :  { %486 = vrot.lane.b32.xlu1 %v484_v19, %s1477_s1 }
 0x71e   :  { %v487_v20 = vpop.permute.xlu1 %486 }
 0x71f   :  { %v489_v21 = vadd.f32 %v487_v20, %v1601_v25 }
 0x721   :  { %1395 = vtanh.f32 %v489_v21 }
 0x72e   :  { %v1396_v22 = vpop.eup %1395 }
 0x72f   :  { %493 = vrot.lane.b32.xlu0 %v1396_v22, %s1479_s3 }
 0x7a1   :  { %v494_v27 = vpop.permute.xlu0 %493 }
 0x7a2   :  { %v496_v29 = vmul.f32 %v494_v27, %v491_v24 }
 0x7a4   :  { %v1648_v30 = vadd.f32 %v499_v28, %v496_v29 }
 0x7a6   :  { %v507_v31 = vrot.slane %v1648_v30, 4  ;;  %v611_v49 = vrot.slane %v1648_v30, 6 }
 0x7a8   :  { %508 = vrot.lane.b32.xlu1 %v507_v31, %s1479_s3 }
 0x81a   :  { %v509_v32 = vpop.permute.xlu1 %508 }
 0x81b   :  { %1313 = vmatmul.mubr.msk.f32.vlgmr.msra.gmra.mxu1 %vm164_vm1, %v509_v32 }
 0x81c   :  { %1327 = vmatpush3.msra.mxu1 %v1539_v2  ;;  %1334 = vmatprep.mubr.msk.f32.mxu1 %vm1476_vm0, %v1475_v0 }
 0x81d   :  { %1328 = vmatprep.subr.mxu1 %v1475_v0 }
 0x81e   :  { %1329 = vmatpush3.msra.mxu1 %v1542_v4 }
 0x81f   :  { %1330 = vmatprep.subr.mxu1 %v1475_v0 }
 0x820   :  { %1331 = vmatpush3.msra.mxu1 %v1545_v6 }
 0x821   :  { %1332 = vmatprep.subr.mxu1 %v1475_v0 }
 0x822   :  { %1333 = vmatpush3.msra.mxu1 %v1549_v8 }
 0x823   :  { %1348 = vmatprep.subr.mxu1 %v1475_v0 }
 0x8db   :  { %v578_v33 = vpop.f32.mrf.mxu1 }
 0x8dc   :  { %v592_v34 = vadd.f32 %v578_v33, %v1592_v17  ;;  %v583_v37 = vrot.slane %v578_v33, 2 }
 0x8dd   :  { %v1314_v35 = vpop.f32.mrf.mxu1 }
 0x8de   :  { %v594_v36 = vrot.slane %v592_v34, 2  ;;  %v585_v38 = vadd.f32 %v583_v37, %v1601_v25 }
 0x8e0   :  { %595 = vrot.lane.b32.xlu0 %v594_v36, %s1477_s1  ;;  %v1184_v39 = vmul.f32 -1.442695, %v585_v38 }
 0x8e2   :  { %1397 = vpow2.f32 %v1184_v39 }
 0x8ef   :  { %v1398_v40 = vpop.eup %1397 }
 0x8f0   :  { %v589_v41 = vadd.f32 1.0, %v1398_v40 }
 0x8f2   :  { %1399 = vrcp.f32 %v589_v41 }
 0x8ff   :  { %v1400_v42 = vpop.eup %1399 }
 0x900   :  { %v605_v48 = vsub.f32 1.0, %v1400_v42  ;;  %v613_v51 = vmul.f32 %v1400_v42, %v611_v49 }
 0x952   :  { %v596_v43 = vpop.permute.xlu0 %595 }
 0x953   :  { %v598_v44 = vmul.f32 %v1400_v42, %v596_v43 }
 0x955   :  { %600 = vrot.lane.b32.xlu1 %v598_v44, %s1477_s1 }
 0x9c7   :  { %v601_v45 = vpop.permute.xlu1 %600 }
 0x9c8   :  { %v603_v46 = vadd.f32 %v601_v45, %v1601_v25 }
 0x9ca   :  { %1401 = vtanh.f32 %v603_v46 }
 0x9d7   :  { %v1402_v47 = vpop.eup %1401 }
 0x9d8   :  { %607 = vrot.lane.b32.xlu0 %v1402_v47, %s1479_s3 }
 0xa4a   :  { %v608_v50 = vpop.permute.xlu0 %607 }
 0xa4b   :  { %v610_v52 = vmul.f32 %v608_v50, %v605_v48 }
 0xa4d   :  { %v1670_v53 = vadd.f32 %v613_v51, %v610_v52 }
 0xa4f   :  { %v621_v54 = vrot.slane %v1670_v53, 6 }
 0xa51   :  { %622 = vrot.lane.b32.xlu1 %v621_v54, %s1479_s3 }
 0xac3   :  { %v623_v55 = vpop.permute.xlu1 %622 }
 0xac4   :  { %1324 = vmatmul.mubr.msk.f32.vlgmr.msra.gmra.mxu0 %vm164_vm1, %v623_v55 }
 0xac5   :  { %1338 = vmatpush3.msra.mxu0 %v1539_v2  ;;  %1345 = vmatprep.mubr.msk.f32.mxu0 %vm1476_vm0, %v1475_v0 }
 0xac6   :  { %1339 = vmatprep.subr.mxu0 %v1475_v0 }
 0xac7   :  { %1340 = vmatpush3.msra.mxu0 %v1542_v4 }
 0xac8   :  { %1341 = vmatprep.subr.mxu0 %v1475_v0 }
 0xac9   :  { %1342 = vmatpush3.msra.mxu0 %v1545_v6 }
 0xaca   :  { %1343 = vmatprep.subr.mxu0 %v1475_v0 }
 0xacb   :  { %1344 = vmatpush3.msra.mxu0 %v1549_v8 }
 0xb84   :  { %v692_v25 = vpop.f32.mrf.mxu0 }
 0xb85   :  { %v703_v56 = vadd.f32 %v692_v25, %v1592_v17  ;;  %v696_v58 = vadd.f32 %v692_v25, %v1599_v23 }
 0xb86   :  { %v1325_v57 = vpop.f32.mrf.mxu0 }
 0xb87   :  { %705 = vrot.lane.b32.xlu0 %v703_v56, %s1477_s1  ;;  %v1186_v59 = vmul.f32 -1.442695, %v696_v58 }
 0xb89   :  { %1403 = vpow2.f32 %v1186_v59 }
 0xb96   :  { %v1404_v60 = vpop.eup %1403 }
 0xb97   :  { %v700_v61 = vadd.f32 1.0, %v1404_v60 }
 0xb99   :  { %1405 = vrcp.f32 %v700_v61 }
 0xba6   :  { %v1406_v62 = vpop.eup %1405 }
 0xba7   :  { %v715_v10 = vsub.f32 1.0, %v1406_v62  ;;  %v722_v12 = vmul.f32 %v1406_v62, %v621_v54 }
 0xbf9   :  { %v706_v1 = vpop.permute.xlu0 %705 }
 0xbfa   :  { %v708_v3 = vmul.f32 %v1406_v62, %v706_v1 }
 0xbfc   :  { %710 = vrot.lane.b32.xlu1 %v708_v3, %s1477_s1 }
 0xc6e   :  { %v711_v5 = vpop.permute.xlu1 %710 }
 0xc6f   :  { %v713_v7 = vadd.f32 %v711_v5, %v1599_v23 }
 0xc71   :  { %1407 = vtanh.f32 %v713_v7 }
 0xc7e   :  { %v1408_v9 = vpop.eup %1407 }
 0xc7f   :  { %717 = vrot.lane.b32.xlu0 %v1408_v9, %s1479_s3 }
 0xcf1   :  { %v718_v11 = vpop.permute.xlu0 %717 }
 0xcf2   :  { %v720_v13 = vmul.f32 %v718_v11, %v715_v10 }
 0xcf4   :  { %v723_v14 = vadd.f32 %v722_v12, %v720_v13 }
 0xcf6   :  { %725 = vrot.lane.b32.xlu1 %v723_v14, %s1479_s3  ;;  %v830_v29 = vrot.slane %v723_v14, 6 }
 0xd68   :  { %v726_v15 = vpop.permute.xlu1 %725 }
 0xd69   :  { %728 = vst.msk [vmem:[#allocation2 + $0x8] sm:$0x3] %vm280_vm3, %v726_v15  ;;  %1335 = vmatmul.mubr.msk.f32.vlgmr.msra.gmra.mxu1 %vm164_vm1, %v726_v15 }
 0xd6a   :  { %1349 = vmatpush3.msra.mxu1 %v1539_v2  ;;  %1356 = vmatprep.mubr.msk.f32.mxu1 %vm1476_vm0, %v1475_v0 }
 0xd6b   :  { %1350 = vmatprep.subr.mxu1 %v1475_v0 }
 0xd6c   :  { %1351 = vmatpush3.msra.mxu1 %v1542_v4 }
 0xd6d   :  { %1352 = vmatprep.subr.mxu1 %v1475_v0 }
 0xd6e   :  { %1353 = vmatpush3.msra.mxu1 %v1545_v6 }
 0xd6f   :  { %1354 = vmatprep.subr.mxu1 %v1475_v0 }
 0xd70   :  { %1355 = vmatpush3.msra.mxu1 %v1549_v8 }
 0xe29   :  { %v797_v16 = vpop.f32.mrf.mxu1 }
 0xe2a   :  { %v811_v18 = vadd.f32 %v797_v16, %v1592_v17  ;;  %v802_v20 = vrot.slane %v797_v16, 6 }
 0xe2b   :  { %v1336_v19 = vpop.f32.mrf.mxu1 }
 0xe2c   :  { %v813_v2 = vrot.slane %v811_v18, 6  ;;  %v804_v21 = vadd.f32 %v802_v20, %v1599_v23 }
 0xe2e   :  { %814 = vrot.lane.b32.xlu0 %v813_v2, %s1477_s1  ;;  %v1188_v22 = vmul.f32 -1.442695, %v804_v21  ;;  %v1068_v2 = vld [vmem:[%s1777_s6 + $0x8] sm:$0xff] }
 0xe30   :  { %1409 = vpow2.f32 %v1188_v22 }
 0xe3d   :  { %v1410_v4 = vpop.eup %1409 }
 0xe3e   :  { %v808_v24 = vadd.f32 1.0, %v1410_v4 }
 0xe40   :  { %1411 = vrcp.f32 %v808_v24 }
 0xe4d   :  { %v1412_v6 = vpop.eup %1411 }
 0xe4e   :  { %v824_v31 = vsub.f32 1.0, %v1412_v6  ;;  %v832_v34 = vmul.f32 %v1412_v6, %v830_v29  ;;  %v1193_v29 = vld [vmem:[%s1778_s7] ss:$0 sm:$0xff] }
 0xea0   :  { %v815_v26 = vpop.permute.xlu0 %814 }
 0xea1   :  { %v817_v0 = vmul.f32 %v1412_v6, %v815_v26 }
 0xea3   :  { %819 = vrot.lane.b32.xlu1 %v817_v0, %s1477_s1 }
 0xf15   :  { %v820_v8 = vpop.permute.xlu1 %819 }
 0xf16   :  { %v822_v27 = vadd.f32 %v820_v8, %v1599_v23 }
 0xf18   :  { %1413 = vtanh.f32 %v822_v27 }
 0xf25   :  { %v1414_v28 = vpop.eup %1413 }
 0xf26   :  { %826 = vrot.lane.b32.xlu0 %v1414_v28, %s1479_s3 }
 0xf98   :  { %v827_v32 = vpop.permute.xlu0 %826 }
 0xf99   :  { %v829_v33 = vmul.f32 %v827_v32, %v824_v31 }
 0xf9b   :  { %v1708_v35 = vadd.f32 %v832_v34, %v829_v33 }
 0xf9d   :  { %v839_v36 = vrot.slane %v1708_v35, 2  ;;  %v943_v55 = vrot.slane %v1708_v35, 6 }
 0xf9f   :  { %840 = vrot.lane.b32.xlu1 %v839_v36, %s1479_s3 }
0x1011   :  { %v841_v37 = vpop.permute.xlu1 %840 }
0x1012   :  { %1346 = vmatmul.mubr.msk.f32.vlgmr.msra.gmra.mxu0 %vm164_vm1, %v841_v37 }
0x10d2   :  { %v910_v38 = vpop.f32.mrf.mxu0 }
0x10d3   :  { %v924_v39 = vadd.f32 %v910_v38, %v1592_v17  ;;  %v915_v42 = vrot.slane %v910_v38, 4 }
0x10d4   :  { %v1347_v40 = vpop.f32.mrf.mxu0 }
0x10d5   :  { %v926_v41 = vrot.slane %v924_v39, 4  ;;  %v917_v43 = vadd.f32 %v915_v42, %v1599_v23 }
0x10d7   :  { %927 = vrot.lane.b32.xlu0 %v926_v41, %s1477_s1  ;;  %v1190_v44 = vmul.f32 -1.442695, %v917_v43 }
0x10d9   :  { %1415 = vpow2.f32 %v1190_v44 }
0x10e6   :  { %v1416_v45 = vpop.eup %1415 }
0x10e7   :  { %v921_v46 = vadd.f32 1.0, %v1416_v45 }
0x10e9   :  { %1417 = vrcp.f32 %v921_v46 }
0x10f6   :  { %v1418_v47 = vpop.eup %1417 }
0x10f7   :  { %v937_v54 = vsub.f32 1.0, %v1418_v47  ;;  %v945_v56 = vmul.f32 %v1418_v47, %v943_v55 }
0x1149   :  { %v928_v48 = vpop.permute.xlu0 %927 }
0x114a   :  { %v930_v49 = vmul.f32 %v1418_v47, %v928_v48 }
0x114c   :  { %932 = vrot.lane.b32.xlu1 %v930_v49, %s1477_s1 }
0x11be   :  { %v933_v50 = vpop.permute.xlu1 %932 }
0x11bf   :  { %v935_v51 = vadd.f32 %v933_v50, %v1599_v23 }
0x11c1   :  { %1419 = vtanh.f32 %v935_v51 }
0x11ce   :  { %v1420_v52 = vpop.eup %1419 }
0x11cf   :  { %939 = vrot.lane.b32.xlu0 %v1420_v52, %s1479_s3 }
0x1241   :  { %v940_v25 = vpop.permute.xlu0 %939 }
0x1242   :  { %v942_v57 = vmul.f32 %v940_v25, %v937_v54 }
0x1244   :  { %v946_v58 = vadd.f32 %v945_v56, %v942_v57 }
0x1246   :  { %v952_v59 = vrot.slane %v946_v58, 4  ;;  %v1056_v21 = vrot.slane %v946_v58, 6 }
0x1248   :  { %953 = vrot.lane.b32.xlu1 %v952_v59, %s1479_s3 }
0x12ba   :  { %v954_v60 = vpop.permute.xlu1 %953 }
0x12bb   :  { %1357 = vmatmul.mubr.msk.f32.vlgmr.msra.gmra.mxu1 %vm164_vm1, %v954_v60 }
0x137b   :  { %v1023_v61 = vpop.f32.mrf.mxu1 }
0x137c   :  { %v1037_v62 = vadd.f32 %v1023_v61, %v1592_v17  ;;  %v1028_v5 = vrot.slane %v1023_v61, 2 }
0x137d   :  { %v1358_v1 = vpop.f32.mrf.mxu1 }
0x137e   :  { %v1039_v3 = vrot.slane %v1037_v62, 2  ;;  %v1030_v7 = vadd.f32 %v1028_v5, %v1599_v23 }
0x1380   :  { %1040 = vrot.lane.b32.xlu0 %v1039_v3, %s1477_s1  ;;  %v1192_v9 = vmul.f32 -1.442695, %v1030_v7 }
0x1382   :  { %1421 = vpow2.f32 %v1192_v9 }
0x138f   :  { %v1422_v10 = vpop.eup %1421 }
0x1390   :  { %v1034_v11 = vadd.f32 1.0, %v1422_v10 }
0x1392   :  { %1423 = vrcp.f32 %v1034_v11 }
0x139f   :  { %v1424_v12 = vpop.eup %1423 }
0x13a0   :  { %v1050_v20 = vsub.f32 1.0, %v1424_v12  ;;  %v1058_v4 = vmul.f32 %v1424_v12, %v1056_v21 }
0x13f2   :  { %v1041_v13 = vpop.permute.xlu0 %1040 }
0x13f3   :  { %v1043_v14 = vmul.f32 %v1424_v12, %v1041_v13 }
0x13f5   :  { %1045 = vrot.lane.b32.xlu1 %v1043_v14, %s1477_s1 }
0x13f9   :  { %388 = vrot.lane.b32.xlu1 %v1626_v63, %s1479_s3 }
0x13fd   :  { %616 = vrot.lane.b32.xlu1 %v1670_v53, %s1479_s3  ;;  %v1069_v53 = vld [vmem:[%s1777_s6 + $0x10] sm:$0xff] }
0x1401   :  { %948 = vrot.lane.b32.xlu1 %v946_v58, %s1479_s3 }
0x1467   :  { %v1046_v17 = vpop.permute.xlu1 %1045 }
0x1468   :  { %v1048_v15 = vadd.f32 %v1046_v17, %v1599_v23  ;;  %v1070_v23 = vld [vmem:[%s1777_s6 + $0x18] sm:$0xff] }
0x1469   :  { %1359 = vmatprep.subr.mxu0 %v1070_v23 }
0x146a   :  { %1425 = vtanh.f32 %v1048_v15  ;;  %1360 = vmatpush3.msra.mxu0 %v1070_v23 }
0x146b   :  { %v389_v16 = vpop.permute.xlu1 %388  ;;  %1361 = vmatprep.subr.mxu0 %v1069_v53 }
0x146c   :  { %392 = vst.msk [vmem:[#allocation2] sm:$0xc] %vm391_vm4, %v389_v16  ;;  %1362 = vmatpush3.msra.mxu0 %v1069_v53 }
0x146d   :  { %1363 = vmatprep.subr.mxu0 %v1068_v2 }
0x146e   :  { %1364 = vmatpush3.msra.mxu0 %v1068_v2 }
0x146f   :  { %v617_v18 = vpop.permute.xlu1 %616 }
0x1470   :  { %620 = vst.msk [vmem:[#allocation2] sm:$0xc0] %vm619_vm5, %v617_v18 }
0x1473   :  { %v949_v19 = vpop.permute.xlu1 %948 }
0x1474   :  { %951 = vst.msk [vmem:[#allocation2 + $0x8] sm:$0x30] %vm505_vm6, %v949_v19 }
0x1477   :  { %v1426_v63 = vpop.eup %1425 }
0x1478   :  { %1052 = vrot.lane.b32.xlu0 %v1426_v63, %s1479_s3 }
0x147c   :  { %502 = vrot.lane.b32.xlu0 %v1648_v30, %s1479_s3  ;;  %v1067_v30 = vld [vmem:[%s1777_s6] sm:$0xff] }
0x147d   :  { %1365 = vmatprep.subr.mxu0 %v1067_v30 }
0x147e   :  { %1366 = vmatpush3.msra.mxu0 %v1067_v30 }
0x1480   :  { %835 = vrot.lane.b32.xlu0 %v1708_v35, %s1479_s3 }
0x14ea   :  { %v1053_v22 = vpop.permute.xlu0 %1052 }
0x14eb   :  { %v1055_v24 = vmul.f32 %v1053_v22, %v1050_v20 }
0x14ed   :  { %v1059_v6 = vadd.f32 %v1058_v4, %v1055_v24 }
0x14ee   :  { %v503_v26 = vpop.permute.xlu0 %502 }
0x14ef   :  { %506 = vst.msk [vmem:[#allocation2] sm:$0x30] %vm505_vm6, %v503_v26  ;;  %1061 = vrot.lane.b32.xlu0 %v1059_v6, %s1479_s3 }
0x14f2   :  { %v836_v0 = vpop.permute.xlu0 %835 }
0x14f3   :  { %838 = vst.msk [vmem:[#allocation2 + $0x8] sm:$0xc] %vm391_vm4, %v836_v0 }
0x14f6   :  { %v1065_v8 = vld [vmem:[#allocation2] sm:$0xff] }
0x14f7   :  { %1367 = vmatprep.mubr.msk.f32.mxu0 %vm164_vm1, %v1065_v8 }
0x1561   :  { %v1062_v27 = vpop.permute.xlu0 %1061 }
0x1562   :  { %1064 = vst.msk [vmem:[#allocation2 + $0x8] sm:$0xc0] %vm619_vm5, %v1062_v27  ;;  %1162 = vst.msk [vmem:[%s1780_s9 - $0x6] sm:$0xc0] %vm619_vm5, %v1062_v27 }
0x1569   :  { %v1066_v28 = vld [vmem:[#allocation2 + $0x8] sm:$0xff] }
0x156a   :  { %1368 = vmatmul.mubr.msk.f32.vlgmr.msra.gmra.mxu0 %vm164_vm1, %v1066_v28 }
0x162a   :  { %v1369_v31 = vpop.f32.mrf.mxu0 }
0x162b   :  { %v1156_v32 = vadd.f32 %v1369_v31, %v1193_v29 }
0x162c   :  { %v1150_v33 = vpop.f32.mrf.mxu0 }
0x162d   :  { %1161 = vst.msk [vmem:[%s1779_s8 + $0x8] sm:$0xff] %vm1159_vm7, %v1156_v32  ;;  %v1151_v34 = vadd.f32 %v1193_v29, %v1150_v33 }
0x162f   :  { %1160 = vst.msk [vmem:[%s1779_s8] sm:$0xff] %vm1159_vm7, %v1151_v34 }
0x1630   :  { %1171 = vsyncpa [#allocation4], 1 }
0x1631   :  { %1172 = vsyncpa [#allocation6], 1 }

</bundles_post_ra>
